<compile_context>
chip_gen: v7x
topology: tpu7x:2x2x1
jax: 0.10.0
libtpu: 0.0.40
codegen_flags: <defaults>
</compile_context>

<pallas_src>
import jax
import jax.numpy as jnp
from jax.experimental import pallas as pl
from jax.experimental.pallas import tpu as pltpu
import numpy as np

# ---------------- synthetic FLAME dimensions (small but lane-aligned) ---------
V = 256                      # mesh vertices (multiple of TV)
TV = 128                     # vertex tile width (lanes) for the grid
NJ = 5                       # joints: [global, neck, jaw, eye_r, eye_l]
PARENTS = [-1, 0, 1, 1, 1]   # kinematic tree
N_SHAPE = 4
N_EXPR = 4
NB = N_SHAPE + N_EXPR        # betas = shape + expr
NP_ = (NJ - 1) * 9           # pose blendshape basis (36)
NF = 64                      # mesh faces
NL = 8                       # landmarks
B = 2                        # batch
OUT_ROWS = 8                 # B*3 = 6 output rows padded to a full sublane tile
KPAD = 8                     # NJ + 1 (ones row) contraction padded to 8


# =============================== Pallas kernel ================================

def _flame_fused_kernel(betas_ref, pf_ref, At_ref, vtpl_ref, sdirs_ref,
                        pdirs_ref, lbsT_ref, out_ref):
    """Per-vertex FLAME forward for one vertex tile (all batch elements).

    betas_ref : (B, NB)          shape+expr coefficients (f32)
    pf_ref    : (B, NP_)         pose feature (rot_mats[1:] - I, flattened, f32)
    At_ref    : (B*12, KPAD)     relative joint transforms, top-3 rows of each
                                 4x4 flattened (row = b*12 + 4r + c), columns:
                                 NJ joints, then the (translation - root) offset
                                 column, then zero padding to KPAD
    vtpl_ref  : (1, 3*TV)        template vertices, this tile, [x | y | z] (f32)
    sdirs_ref : (NB, 3*TV)       shape+expr basis, this tile (bf16)
    pdirs_ref : (NP_, 3*TV)      pose basis, this tile (bf16)
    lbsT_ref  : (KPAD, TV)       skinning weights^T (+ ones row, + zero pad)
    out_ref   : (OUT_ROWS, TV)   posed vertices, row = b*3 + coord (rows >= B*3
                                 are padding)
    """
    bsz = betas_ref.shape[0]
    tv = lbsT_ref.shape[1]

    # Blendshapes: lane-dense (., 3*TV) matmuls, bf16 weights, f32 accumulation.
    betas_b = betas_ref[...].astype(jnp.bfloat16)
    pf_b = pf_ref[...].astype(jnp.bfloat16)
    v_posed = (vtpl_ref[...]
               + jnp.dot(betas_b, sdirs_ref[...],
                         preferred_element_type=jnp.float32)
               + jnp.dot(pf_b, pdirs_ref[...],
                         preferred_element_type=jnp.float32))            # (B, 3*TV)

    # Per-vertex skinning transforms for the tile, all batch elements at once:
    # Tmix[b*12 + 4r + c, v] = sum_j w[v, j] * A[b, j, r, c]  (+ offset on c==3)
    Tmix = jnp.dot(At_ref[...], lbsT_ref[...],
                   preferred_element_type=jnp.float32)                   # (B*12, TV)

    # Apply transforms with pure VPU mul-adds; accumulate all rows in registers
    # and issue ONE dense (OUT_ROWS, TV) store (no masked sub-sublane stores,
    # no read-back of the output block).
    rows = []
    for b in range(bsz):
        x = v_posed[b:b + 1, 0 * tv:1 * tv]
        y = v_posed[b:b + 1, 1 * tv:2 * tv]
        z = v_posed[b:b + 1, 2 * tv:3 * tv]
        for r in range(3):
            k = b * 12 + 4 * r
            rows.append(Tmix[k + 0:k + 1, :] * x
                        + Tmix[k + 1:k + 2, :] * y
                        + Tmix[k + 2:k + 3, :] * z
                        + Tmix[k + 3:k + 4, :])                          # (1, TV)
    n_pad = out_ref.shape[0] - bsz * 3
    if n_pad > 0:
        rows.append(jnp.zeros((n_pad, tv), jnp.float32))
    out_ref[...] = jnp.concatenate(rows, axis=0)


def flame_fused_pallas(betas, pose_feature, At_ext, vtpl_flat, sdirs2d,
                       pdirs2d, lbsT_ext):
    n_tiles = V // TV

    def small(shape):  # tiny full-array inputs, same block for every tile
        return pl.BlockSpec(shape, lambda t: (0, 0))

    return pl.pallas_call(
        _flame_fused_kernel,
        out_shape=jax.ShapeDtypeStruct((OUT_ROWS, V), jnp.float32),
        grid=(n_tiles,),
        in_specs=[
            small((B, NB)),                                   # betas
            small((B, NP_)),                                  # pose feature
            small((B * 12, KPAD)),                            # At_ext
            pl.BlockSpec((1, 3 * TV), lambda t: (0, t)),      # template tile
            pl.BlockSpec((NB, 3 * TV), lambda t: (0, t)),     # shape/expr basis tile
            pl.BlockSpec((NP_, 3 * TV), lambda t: (0, t)),    # pose basis tile
            pl.BlockSpec((KPAD, TV), lambda t: (0, t)),       # skinning weights tile
        ],
        out_specs=pl.BlockSpec((OUT_ROWS, TV), lambda t: (0, t)),
        compiler_params=pltpu.CompilerParams(
            dimension_semantics=("parallel",)),
    )(betas, pose_feature, At_ext, vtpl_flat, sdirs2d, pdirs2d, lbsT_ext)


# =============================== JAX glue =====================================

def apply_rotation_limit(rotation, limit):
    r_min = limit[:, 0][None, :]
    r_max = limit[:, 1][None, :]
    diff = r_max - r_min
    return r_min + (jnp.tanh(rotation) + 1.0) / 2.0 * diff


def batch_rodrigues(rot_vecs):
    """rot_vecs: (N, 3) axis-angle -> (N, 3, 3) rotation matrices."""
    angle = jnp.linalg.norm(rot_vecs + 1e-8, axis=1, keepdims=True)      # (N, 1)
    rot_dir = rot_vecs / angle
    cos = jnp.cos(angle)[..., None]                                      # (N, 1, 1)
    sin = jnp.sin(angle)[..., None]
    rx, ry, rz = rot_dir[:, 0:1], rot_dir[:, 1:2], rot_dir[:, 2:3]
    zeros = jnp.zeros_like(rx)
    K = jnp.concatenate([zeros, -rz, ry,
                         rz, zeros, -rx,
                         -ry, rx, zeros], axis=1).reshape(-1, 3, 3)
    ident = jnp.eye(3, dtype=rot_vecs.dtype)[None]
    return ident + sin * K + (1.0 - cos) * jnp.matmul(K, K)


def batch_rigid_transform(rot_mats, joints):
    """rot_mats: (B, NJ, 3, 3); joints: (B, NJ, 3) -> posed joints + rel 4x4."""
    b = joints.shape[0]
    parent_joints = jnp.concatenate(
        [jnp.zeros((b, 1, 3), joints.dtype), joints[:, PARENTS[1:]]], axis=1)
    rel_joints = joints - parent_joints
    tm = jnp.concatenate([rot_mats, rel_joints[..., None]], axis=-1)      # (B,NJ,3,4)
    bottom = jnp.tile(jnp.array([0., 0., 0., 1.], joints.dtype)
                      .reshape(1, 1, 1, 4), (b, NJ, 1, 1))
    tm = jnp.concatenate([tm, bottom], axis=-2)                           # (B,NJ,4,4)
    chain = [tm[:, 0]]
    for i in range(1, NJ):
        chain.append(jnp.matmul(chain[PARENTS[i]], tm[:, i]))
    transforms = jnp.stack(chain, axis=1)                                 # (B,NJ,4,4)
    posed_joints = transforms[:, :, :3, 3]
    joints_hom = jnp.concatenate(
        [joints, jnp.zeros((b, NJ, 1), joints.dtype)], axis=-1)[..., None]
    init_bone = jnp.matmul(transforms, joints_hom)                        # (B,NJ,4,1)
    rel_transforms = transforms - jnp.pad(
        init_bone, ((0, 0), (0, 0), (0, 0), (3, 0)))
    return posed_joints, rel_transforms


def flame_forward(params, shape, expr, rotation, neck, jaw, eyes, translation):
    """Equivalent of FlameHead.forward(..., zero_centered=True,
    use_rotation_limits=True, return_landmarks=True)."""
    bsz = shape.shape[0]
    # rotation limits (tanh remap)
    neck = apply_rotation_limit(neck, params['neck_limits'])
    jaw = apply_rotation_limit(jaw, params['jaw_limits'])
    eye_r = apply_rotation_limit(eyes[:, :3], params['eye_limits'])
    eye_l = apply_rotation_limit(eyes[:, 3:], params['eye_limits'])

    betas = jnp.concatenate([shape, expr], axis=1)                        # (B, NB)
    full_pose = jnp.concatenate([rotation, neck, jaw, eye_r, eye_l], axis=1)

    # ---- tiny O(B*NJ) per-joint math, hoisted out of the kernel ----
    rot_mats = batch_rodrigues(full_pose.reshape(-1, 3)).reshape(bsz, NJ, 3, 3)
    pose_feature = (rot_mats[:, 1:]
                    - jnp.eye(3, dtype=jnp.float32)).reshape(bsz, NP_)

    # joints = J_regressor @ (v_template + shape blendshapes), exactly folded
    # onto betas via a precomputed per-joint regressor.
    joints = params['J_template'][None] + jnp.einsum(
        'bn,njd->bjd', betas, params['J_shapedirs'])                      # (B, NJ, 3)
    posed_joints, A = batch_rigid_transform(rot_mats, joints)

    # Zero-centering on root joint + global translation folded into an extra
    # column (mates with the all-ones skinning-weight row inside the kernel).
    off = translation - posed_joints[:, 0]                                # (B, 3)
    At = jnp.transpose(A[:, :, :3, :].reshape(bsz, NJ, 12), (0, 2, 1))    # (B,12,NJ)
    off_col = jnp.zeros((bsz, 12), jnp.float32).at[
        :, jnp.array([3, 7, 11])].set(off)                                # (B,12)
    At_ext = jnp.concatenate(
        [At, off_col[..., None],
         jnp.zeros((bsz, 12, KPAD - NJ - 1), jnp.float32)], axis=2)       # (B,12,KPAD)
    At_ext = At_ext.reshape(bsz * 12, KPAD)

    # ---- single fused Pallas kernel: all per-vertex work, tiled over V ----
    out = flame_fused_pallas(
        betas, pose_feature, At_ext,
        params['v_template_flat'], params['shapedirs2d'], params['posedirs2d'],
        params['lbs_weights_T_ext'])                                      # (8, V)

    vertices = jnp.transpose(out[:bsz * 3].reshape(bsz, 3, V), (0, 2, 1))  # (B,V,3)

    # Landmarks: gather + barycentric combine on <= NL*3 vertices (moved out of
    # the kernel; keeps the V grid axis a pure "parallel" map).
    lmk_verts = vertices[:, params['lmk_face_verts']]                     # (B,NL,3,3)
    landmarks = jnp.einsum('blkd,lk->bld', lmk_verts, params['bary'])     # (B,NL,3)
    return vertices, landmarks


# =============================== setup & main =================================

def make_params():
    key = jax.random.PRNGKey(0)
    ks = jax.random.split(key, 8)
    v_template = jax.random.normal(ks[0], (V, 3), jnp.float32) * 0.1
    shapedirs = jax.random.normal(ks[1], (V, 3, NB), jnp.float32) * 0.01
    posedirs = jax.random.normal(ks[2], (V, 3, NP_), jnp.float32) * 0.01
    J_regressor = jax.nn.softmax(
        jax.random.normal(ks[3], (NJ, V), jnp.float32), axis=-1)
    lbs_weights = jax.nn.softmax(
        jax.random.normal(ks[4], (V, NJ), jnp.float32) * 2.0, axis=-1)
    faces = jax.random.randint(ks[5], (NF, 3), 0, V, dtype=jnp.int32)
    lmk_faces_idx = jax.random.randint(ks[6], (NL,), 0, NF, dtype=jnp.int32)
    bary = jax.random.uniform(ks[7], (NL, 3), jnp.float32)
    bary = bary / jnp.sum(bary, axis=-1, keepdims=True)
    lmk_face_verts = faces[lmk_faces_idx]                                 # (NL, 3)

    n_tiles = V // TV

    # Tile-major, coord-within-tile flat layout: column = t*3*TV + d*TV + local,
    # so a grid step sees contiguous [x_tile | y_tile | z_tile] lanes.
    def tile_coord_major(x_v3):                                           # (V,3)
        return jnp.transpose(x_v3.reshape(n_tiles, TV, 3),
                             (0, 2, 1)).reshape(1, 3 * V)

    def dirs_layout(dirs):                                                # (V,3,Nb)
        nb = dirs.shape[-1]
        d = jnp.transpose(dirs, (2, 0, 1)).reshape(nb, n_tiles, TV, 3)
        return jnp.transpose(d, (0, 1, 3, 2)).reshape(nb, 3 * V)

    v_template_flat = tile_coord_major(v_template)                        # (1, 3V) f32
    shapedirs2d = dirs_layout(shapedirs).astype(jnp.bfloat16)             # (NB, 3V)
    posedirs2d = dirs_layout(posedirs).astype(jnp.bfloat16)               # (NP_,3V)

    # skinning weights^T + all-ones row (mates with the offset column) + pad
    lbs_weights_T_ext = jnp.concatenate(
        [lbs_weights.T, jnp.ones((1, V), jnp.float32),
         jnp.zeros((KPAD - NJ - 1, V), jnp.float32)], axis=0)             # (KPAD, V)

    # joint regression folded onto betas: joints = J_template + betas @ J_shapedirs
    J_template = J_regressor @ v_template                                 # (NJ, 3)
    J_shapedirs = jnp.einsum('jv,vdn->njd', J_regressor, shapedirs)       # (NB,NJ,3)

    deg2rad = np.pi / 180.0
    neck_limits = jnp.array([[-90, 90], [-60, 60], [-80, 80]], jnp.float32) * deg2rad
    jaw_limits = jnp.array([[-5, 60], [-0.1, 0.1], [-0.1, 0.1]], jnp.float32) * deg2rad
    eye_limits = jnp.array([[-50, 50], [-50, 50], [-0.1, 0.1]], jnp.float32) * deg2rad

    return dict(
        v_template_flat=v_template_flat,
        shapedirs2d=shapedirs2d,
        posedirs2d=posedirs2d,
        lbs_weights_T_ext=lbs_weights_T_ext,
        lmk_face_verts=lmk_face_verts,
        bary=bary,
        J_template=J_template,
        J_shapedirs=J_shapedirs,
        neck_limits=neck_limits,
        jaw_limits=jaw_limits,
        eye_limits=eye_limits,
    )
    # TODO(synk): face_uvcoords / UV buffers from load_obj and neck_kin_chain are
    # not used in forward() and are omitted; the custom `lbs(..., faces=faces)`
    # is implemented as standard SMPL-style LBS.


if __name__ == "__main__":
    params = make_params()
    ik = jax.random.split(jax.random.PRNGKey(0), 7)
    shape = jax.random.normal(ik[0], (B, N_SHAPE), jnp.float32) * 0.5
    expr = jax.random.normal(ik[1], (B, N_EXPR), jnp.float32) * 0.5
    rotation = jax.random.normal(ik[2], (B, 3), jnp.float32) * 0.1
    neck = jax.random.normal(ik[3], (B, 3), jnp.float32) * 0.5
    jaw = jax.random.normal(ik[4], (B, 3), jnp.float32) * 0.5
    eyes = jax.random.normal(ik[5], (B, 6), jnp.float32) * 0.5
    translation = jax.random.normal(ik[6], (B, 3), jnp.float32) * 0.05

    fwd = jax.jit(flame_forward)
    vertices, landmarks = fwd(params, shape, expr, rotation, neck, jaw, eyes,
                              translation)
    jax.block_until_ready((vertices, landmarks))
    assert vertices.shape == (B, V, 3) and landmarks.shape == (B, NL, 3)
    assert bool(jnp.all(jnp.isfinite(vertices))) and bool(jnp.all(jnp.isfinite(landmarks)))
    print("KERNEL_OK")
</pallas_src>

<mosaic_0001>
module attributes {stable_mosaic.version = 11 : i64} {
  func.func @_flame_fused_kernel(%arg0: i32, %arg1: memref<2x8xf32, #tpu.memory_space<vmem>>, %arg2: memref<2x36xf32, #tpu.memory_space<vmem>>, %arg3: memref<24x8xf32, #tpu.memory_space<vmem>>, %arg4: memref<1x384xf32, #tpu.memory_space<vmem>>, %arg5: memref<8x384xbf16, #tpu.memory_space<vmem>>, %arg6: memref<36x384xbf16, #tpu.memory_space<vmem>>, %arg7: memref<8x128xf32, #tpu.memory_space<vmem>>, %arg8: memref<8x128xf32, #tpu.memory_space<vmem>>) attributes {dimension_semantics = [#tpu.dimension_semantics<parallel>], iteration_bounds = array<i64: 2>, scalar_prefetch = 0 : i64, scratch_operands = 0 : i64, tpu.core_type = #tpu.core_type<tc>, window_params = [{pipeline_mode = #tpu.pipeline_mode<synchronous>, transform_indices = @transform_0, window_bounds = array<i64: 2, 8>}, {pipeline_mode = #tpu.pipeline_mode<synchronous>, transform_indices = @transform_1, window_bounds = array<i64: 2, 36>}, {pipeline_mode = #tpu.pipeline_mode<synchronous>, transform_indices = @transform_2, window_bounds = array<i64: 24, 8>}, {transform_indices = @transform_3, window_bounds = array<i64: 1, 384>}, {transform_indices = @transform_4, window_bounds = array<i64: 8, 384>}, {transform_indices = @transform_5, window_bounds = array<i64: 36, 384>}, {transform_indices = @transform_6, window_bounds = array<i64: 8, 128>}, {transform_indices = @transform_7, window_bounds = array<i64: 8, 128>}]} {
    %c0 = arith.constant 0 : index
    %c0_0 = arith.constant 0 : index
    %0 = vector.load %arg1[%c0, %c0_0] : memref<2x8xf32, #tpu.memory_space<vmem>>, vector<2x8xf32>
    %1 = arith.truncf %0 : vector<2x8xf32> to vector<2x8xbf16>
    %c0_1 = arith.constant 0 : index
    %c0_2 = arith.constant 0 : index
    %2 = vector.load %arg2[%c0_1, %c0_2] : memref<2x36xf32, #tpu.memory_space<vmem>>, vector<2x36xf32>
    %3 = arith.truncf %2 : vector<2x36xf32> to vector<2x36xbf16>
    %c0_3 = arith.constant 0 : index
    %c0_4 = arith.constant 0 : index
    %4 = vector.load %arg4[%c0_3, %c0_4] : memref<1x384xf32, #tpu.memory_space<vmem>>, vector<1x384xf32>
    %c0_5 = arith.constant 0 : index
    %c0_6 = arith.constant 0 : index
    %5 = vector.load %arg5[%c0_5, %c0_6] : memref<8x384xbf16, #tpu.memory_space<vmem>>, vector<8x384xbf16>
    %cst = arith.constant dense<0.000000e+00> : vector<2x384xf32>
    %6 = tpu.matmul %1, %5, %cst {dimension_numbers = #tpu.dot_dimension_numbers<[1], [0], [0], [1], [0, 0, 1, 1], [], []>} : vector<2x8xbf16>, vector<8x384xbf16>, vector<2x384xf32> -> vector<2x384xf32>
    %7 = vector.broadcast %4 : vector<1x384xf32> to vector<2x384xf32>
    %8 = arith.addf %7, %6 : vector<2x384xf32>
    %c0_7 = arith.constant 0 : index
    %c0_8 = arith.constant 0 : index
    %9 = vector.load %arg6[%c0_7, %c0_8] : memref<36x384xbf16, #tpu.memory_space<vmem>>, vector<36x384xbf16>
    %cst_9 = arith.constant dense<0.000000e+00> : vector<2x384xf32>
    %10 = tpu.matmul %3, %9, %cst_9 {dimension_numbers = #tpu.dot_dimension_numbers<[1], [0], [0], [1], [0, 0, 1, 1], [], []>} : vector<2x36xbf16>, vector<36x384xbf16>, vector<2x384xf32> -> vector<2x384xf32>
    %11 = arith.addf %8, %10 : vector<2x384xf32>
    %c0_10 = arith.constant 0 : index
    %c0_11 = arith.constant 0 : index
    %12 = vector.load %arg3[%c0_10, %c0_11] : memref<24x8xf32, #tpu.memory_space<vmem>>, vector<24x8xf32>
    %c0_12 = arith.constant 0 : index
    %c0_13 = arith.constant 0 : index
    %13 = vector.load %arg7[%c0_12, %c0_13] : memref<8x128xf32, #tpu.memory_space<vmem>>, vector<8x128xf32>
    %cst_14 = arith.constant dense<0.000000e+00> : vector<24x128xf32>
    %14 = tpu.matmul %12, %13, %cst_14 {dimension_numbers = #tpu.dot_dimension_numbers<[1], [0], [0], [1], [0, 0, 1, 1], [], []>} : vector<24x8xf32>, vector<8x128xf32>, vector<24x128xf32> -> vector<24x128xf32>
    %15 = vector.extract_strided_slice %11 {offsets = [0, 0], sizes = [1, 128], strides = [1, 1]} : vector<2x384xf32> to vector<1x128xf32>
    %16 = vector.extract_strided_slice %11 {offsets = [0, 128], sizes = [1, 128], strides = [1, 1]} : vector<2x384xf32> to vector<1x128xf32>
    %17 = vector.extract_strided_slice %11 {offsets = [0, 256], sizes = [1, 128], strides = [1, 1]} : vector<2x384xf32> to vector<1x128xf32>
    %18 = vector.extract_strided_slice %14 {offsets = [0, 0], sizes = [1, 128], strides = [1, 1]} : vector<24x128xf32> to vector<1x128xf32>
    %19 = arith.mulf %18, %15 : vector<1x128xf32>
    %20 = vector.extract_strided_slice %14 {offsets = [1, 0], sizes = [1, 128], strides = [1, 1]} : vector<24x128xf32> to vector<1x128xf32>
    %21 = arith.mulf %20, %16 : vector<1x128xf32>
    %22 = arith.addf %19, %21 : vector<1x128xf32>
    %23 = vector.extract_strided_slice %14 {offsets = [2, 0], sizes = [1, 128], strides = [1, 1]} : vector<24x128xf32> to vector<1x128xf32>
    %24 = arith.mulf %23, %17 : vector<1x128xf32>
    %25 = arith.addf %22, %24 : vector<1x128xf32>
    %26 = vector.extract_strided_slice %14 {offsets = [3, 0], sizes = [1, 128], strides = [1, 1]} : vector<24x128xf32> to vector<1x128xf32>
    %27 = arith.addf %25, %26 : vector<1x128xf32>
    %28 = vector.extract_strided_slice %14 {offsets = [4, 0], sizes = [1, 128], strides = [1, 1]} : vector<24x128xf32> to vector<1x128xf32>
    %29 = arith.mulf %28, %15 : vector<1x128xf32>
    %30 = vector.extract_strided_slice %14 {offsets = [5, 0], sizes = [1, 128], strides = [1, 1]} : vector<24x128xf32> to vector<1x128xf32>
    %31 = arith.mulf %30, %16 : vector<1x128xf32>
    %32 = arith.addf %29, %31 : vector<1x128xf32>
    %33 = vector.extract_strided_slice %14 {offsets = [6, 0], sizes = [1, 128], strides = [1, 1]} : vector<24x128xf32> to vector<1x128xf32>
    %34 = arith.mulf %33, %17 : vector<1x128xf32>
    %35 = arith.addf %32, %34 : vector<1x128xf32>
    %36 = vector.extract_strided_slice %14 {offsets = [7, 0], sizes = [1, 128], strides = [1, 1]} : vector<24x128xf32> to vector<1x128xf32>
    %37 = arith.addf %35, %36 : vector<1x128xf32>
    %38 = vector.extract_strided_slice %14 {offsets = [8, 0], sizes = [1, 128], strides = [1, 1]} : vector<24x128xf32> to vector<1x128xf32>
    %39 = arith.mulf %38, %15 : vector<1x128xf32>
    %40 = vector.extract_strided_slice %14 {offsets = [9, 0], sizes = [1, 128], strides = [1, 1]} : vector<24x128xf32> to vector<1x128xf32>
    %41 = arith.mulf %40, %16 : vector<1x128xf32>
    %42 = arith.addf %39, %41 : vector<1x128xf32>
    %43 = vector.extract_strided_slice %14 {offsets = [10, 0], sizes = [1, 128], strides = [1, 1]} : vector<24x128xf32> to vector<1x128xf32>
    %44 = arith.mulf %43, %17 : vector<1x128xf32>
    %45 = arith.addf %42, %44 : vector<1x128xf32>
    %46 = vector.extract_strided_slice %14 {offsets = [11, 0], sizes = [1, 128], strides = [1, 1]} : vector<24x128xf32> to vector<1x128xf32>
    %47 = arith.addf %45, %46 : vector<1x128xf32>
    %48 = vector.extract_strided_slice %11 {offsets = [1, 0], sizes = [1, 128], strides = [1, 1]} : vector<2x384xf32> to vector<1x128xf32>
    %49 = vector.extract_strided_slice %11 {offsets = [1, 128], sizes = [1, 128], strides = [1, 1]} : vector<2x384xf32> to vector<1x128xf32>
    %50 = vector.extract_strided_slice %11 {offsets = [1, 256], sizes = [1, 128], strides = [1, 1]} : vector<2x384xf32> to vector<1x128xf32>
    %51 = vector.extract_strided_slice %14 {offsets = [12, 0], sizes = [1, 128], strides = [1, 1]} : vector<24x128xf32> to vector<1x128xf32>
    %52 = arith.mulf %51, %48 : vector<1x128xf32>
    %53 = vector.extract_strided_slice %14 {offsets = [13, 0], sizes = [1, 128], strides = [1, 1]} : vector<24x128xf32> to vector<1x128xf32>
    %54 = arith.mulf %53, %49 : vector<1x128xf32>
    %55 = arith.addf %52, %54 : vector<1x128xf32>
    %56 = vector.extract_strided_slice %14 {offsets = [14, 0], sizes = [1, 128], strides = [1, 1]} : vector<24x128xf32> to vector<1x128xf32>
    %57 = arith.mulf %56, %50 : vector<1x128xf32>
    %58 = arith.addf %55, %57 : vector<1x128xf32>
    %59 = vector.extract_strided_slice %14 {offsets = [15, 0], sizes = [1, 128], strides = [1, 1]} : vector<24x128xf32> to vector<1x128xf32>
    %60 = arith.addf %58, %59 : vector<1x128xf32>
    %61 = vector.extract_strided_slice %14 {offsets = [16, 0], sizes = [1, 128], strides = [1, 1]} : vector<24x128xf32> to vector<1x128xf32>
    %62 = arith.mulf %61, %48 : vector<1x128xf32>
    %63 = vector.extract_strided_slice %14 {offsets = [17, 0], sizes = [1, 128], strides = [1, 1]} : vector<24x128xf32> to vector<1x128xf32>
    %64 = arith.mulf %63, %49 : vector<1x128xf32>
    %65 = arith.addf %62, %64 : vector<1x128xf32>
    %66 = vector.extract_strided_slice %14 {offsets = [18, 0], sizes = [1, 128], strides = [1, 1]} : vector<24x128xf32> to vector<1x128xf32>
    %67 = arith.mulf %66, %50 : vector<1x128xf32>
    %68 = arith.addf %65, %67 : vector<1x128xf32>
    %69 = vector.extract_strided_slice %14 {offsets = [19, 0], sizes = [1, 128], strides = [1, 1]} : vector<24x128xf32> to vector<1x128xf32>
    %70 = arith.addf %68, %69 : vector<1x128xf32>
    %71 = vector.extract_strided_slice %14 {offsets = [20, 0], sizes = [1, 128], strides = [1, 1]} : vector<24x128xf32> to vector<1x128xf32>
    %72 = arith.mulf %71, %48 : vector<1x128xf32>
    %73 = vector.extract_strided_slice %14 {offsets = [21, 0], sizes = [1, 128], strides = [1, 1]} : vector<24x128xf32> to vector<1x128xf32>
    %74 = arith.mulf %73, %49 : vector<1x128xf32>
    %75 = arith.addf %72, %74 : vector<1x128xf32>
    %76 = vector.extract_strided_slice %14 {offsets = [22, 0], sizes = [1, 128], strides = [1, 1]} : vector<24x128xf32> to vector<1x128xf32>
    %77 = arith.mulf %76, %50 : vector<1x128xf32>
    %78 = arith.addf %75, %77 : vector<1x128xf32>
    %79 = vector.extract_strided_slice %14 {offsets = [23, 0], sizes = [1, 128], strides = [1, 1]} : vector<24x128xf32> to vector<1x128xf32>
    %80 = arith.addf %78, %79 : vector<1x128xf32>
    %cst_15 = arith.constant 0.000000e+00 : f32
    %81 = vector.broadcast %cst_15 : f32 to vector<2x128xf32>
    %82 = tpu.concatenate %27, %37, %47, %60, %70, %80, %81 in 0 : vector<1x128xf32>, vector<1x128xf32>, vector<1x128xf32>, vector<1x128xf32>, vector<1x128xf32>, vector<1x128xf32>, vector<2x128xf32> -> vector<8x128xf32>
    %c0_16 = arith.constant 0 : index
    %c0_17 = arith.constant 0 : index
    %83 = vector.load %arg8[%c0_16, %c0_17] : memref<8x128xf32, #tpu.memory_space<vmem>>, vector<8x128xf32>
    tpu.vector_store %arg8[%c0_16, %c0_17], %82 {strides = array<i32>} : memref<8x128xf32, #tpu.memory_space<vmem>>, vector<8x128xf32>,
    return
  }
  func.func @transform_0(%arg0: i32) -> (i32, i32) {
    %c0_i32 = arith.constant 0 : i32
    %c0_i32_0 = arith.constant 0 : i32
    %c0_i32_1 = arith.constant 0 : i32
    return %c0_i32, %c0_i32_0 : i32, i32
  }
  func.func @transform_1(%arg0: i32) -> (i32, i32) {
    %c0_i32 = arith.constant 0 : i32
    %c0_i32_0 = arith.constant 0 : i32
    %c0_i32_1 = arith.constant 0 : i32
    return %c0_i32, %c0_i32_0 : i32, i32
  }
  func.func @transform_2(%arg0: i32) -> (i32, i32) {
    %c0_i32 = arith.constant 0 : i32
    %c0_i32_0 = arith.constant 0 : i32
    %c0_i32_1 = arith.constant 0 : i32
    return %c0_i32, %c0_i32_0 : i32, i32
  }
  func.func @transform_3(%arg0: i32) -> (i32, i32) {
    %c0_i32 = arith.constant 0 : i32
    %c0_i32_0 = arith.constant 0 : i32
    return %c0_i32, %arg0 : i32, i32
  }
  func.func @transform_4(%arg0: i32) -> (i32, i32) {
    %c0_i32 = arith.constant 0 : i32
    %c0_i32_0 = arith.constant 0 : i32
    return %c0_i32, %arg0 : i32, i32
  }
  func.func @transform_5(%arg0: i32) -> (i32, i32) {
    %c0_i32 = arith.constant 0 : i32
    %c0_i32_0 = arith.constant 0 : i32
    return %c0_i32, %arg0 : i32, i32
  }
  func.func @transform_6(%arg0: i32) -> (i32, i32) {
    %c0_i32 = arith.constant 0 : i32
    %c0_i32_0 = arith.constant 0 : i32
    return %c0_i32, %arg0 : i32, i32
  }
  func.func @transform_7(%arg0: i32) -> (i32, i32) {
    %c0_i32 = arith.constant 0 : i32
    %c0_i32_0 = arith.constant 0 : i32
    return %c0_i32, %arg0 : i32, i32
  }
}

</mosaic_0001>

<bundles_post_ra>
// kernel: flame_forward.1
= control target key start
LH: loop header
LB: loop body
LE: loop exit
PB: predicated region body
PF: predicated region fallthrough
CT: control target
= control target key end

     0   :  { %s1179_s24 = smov 0   ;;  %s1181_s25 = smov 0   ;;  %s1308_s0 = inlined_call_operand.vmem [shape: f32[2,8], index: 0, kind: input, shape index: {}]   ;;  %s1309_s1 = inlined_call_operand.vmem [shape: f32[2,36], index: 1, kind: input, shape index: {}]   ;;  %s1310_s2 = inlined_call_operand.vmem [shape: f32[24,8], index: 2, kind: input, shape index: {}]   ;;  %s1311_s3 = inlined_call_operand.vmem [shape: f32[1,768], index: 3, kind: input, shape index: {}]   ;;  %s1312_s4 = inlined_call_operand.vmem [shape: bf16[8,768], index: 4, kind: input, shape index: {}]   ;;  %s1313_s5 = inlined_call_operand.vmem [shape: bf16[36,768], index: 5, kind: input, shape index: {}]   ;;  %s1314_s6 = inlined_call_operand.vmem [shape: f32[8,256], index: 6, kind: input, shape index: {}]   ;;  %s1315_s7 = inlined_call_operand.vmem [shape: f32[8,256], index: 7, kind: output, shape index: {}]  }
   0x1   :  { %s1183_s26 = smov 0  }
   0x2 LB: > { %s1195_s27 = sadd.s32 4294967295, %s1134_s26   ;;  %s1198_s28 = sadd.s32 1, %s1134_s26   ;;  %s1134_s26 = sphi %s1183_s26, %s1318_s26   ;;  %s1130_s25 = sphi %s1181_s25, %s1317_s25   ;;  %s1126_s24 = sphi %s1179_s24, %s1316_s24  }
   0x3   : > { %s136_s29 = ssub.s32 %s1134_s26, %s1198_s28  ;;  %s139_s30 = sadd.s32 1, %s1130_s25 }
   0x4   : > { %p137_p0 = scmp.eq.s32.totalorder %s136_s29, 0  ;;  %p146_p1 = scmp.ne.s32.totalorder %s1130_s25, %s1126_s24 }
   0x5   : > { %p147_p2 = scmp.eq.s32.totalorder %s1134_s26, 0  ;;  %p983_p4 = scmp.ge.s32.totalorder %s1134_s26, 2 }
   0x6   : > { %s1207_s8 = scalar_select %p137_p0, %s1130_s25, %s139_s30  }
   0x7   : > { %p148_p3 = por %p147_p2, %p146_p1  ;;  %233 = sbr.rel (%p983_p4) target bundleno = 25 (0x19), region = 28 }
   0xe   : > { %253 = sbr.rel (!%p148_p3) target bundleno = 25 (0x19), region = 40  ;;  %s255_s9 = sand.u32 (%p148_p3), 1, %s1130_s25  }
   0xf   : > { %s1022_s10 = smul.u32 (%p148_p3), 12, %s1134_s26 }
  0x10   : > { %s1069_s11 = smul.u32 (%p148_p3), 60, %s255_s9 }
  0x11   : > { %s260_s14 = scalar_lea.vmem (%p148_p3), %s1313_s5, %s1022_s10 }
  0x12   : > { %v275_v0 = vld [vmem:[%s260_s14] sm:$0xff] (%p148_p3)  ;;  %v277_v1 = vld [vmem:[%s260_s14 + $0x18] sm:$0xff] (%p148_p3)  ;;  %v279_v2 = vld [vmem:[%s260_s14 + $0x30] sm:$0xff] (%p148_p3)  ;;  %s257_s15 = scalar_lea.vmem (%p148_p3), [#allocation2], %s1069_s11 }
  0x13   : > { %276 = vst [vmem:[%s257_s15] sm:$0xff] (%p148_p3), %v275_v0  ;;  %278 = vst [vmem:[%s257_s15 + $0xc] sm:$0xff] (%p148_p3), %v277_v1  ;;  %v281_v3 = vld [vmem:[%s260_s14 + $0x48] sm:$0xff] (%p148_p3)  ;;  %v283_v4 = vld [vmem:[%s260_s14 + $0x60] sm:$0xff] (%p148_p3) }
  0x14   : > { %280 = vst [vmem:[%s257_s15 + $0x18] sm:$0xff] (%p148_p3), %v279_v2  ;;  %v985_v5 = vld [vmem:[%s260_s14 + $0x8] sm:$0xf] (%p148_p3)  ;;  %282 = vst [vmem:[%s257_s15 + $0x24] sm:$0xff] (%p148_p3), %v281_v3  ;;  %v987_v6 = vld [vmem:[%s260_s14 + $0x20] sm:$0xf] (%p148_p3) }
  0x15   : > { %284 = vst [vmem:[%s257_s15 + $0x30] sm:$0xff] %v283_v4  ;;  %986 = vst [vmem:[%s257_s15 + $0x8] sm:$0xf] %v985_v5  ;;  %v989_v7 = vld [vmem:[%s260_s14 + $0x38] sm:$0xf] }
  0x16   : > { %v991_v8 = vld [vmem:[%s260_s14 + $0x50] sm:$0xf]  ;;  %988 = vst [vmem:[%s257_s15 + $0x14] sm:$0xf] %v987_v6  ;;  %990 = vst [vmem:[%s257_s15 + $0x20] sm:$0xf] %v989_v7 }
  0x17   : > { %992 = vst [vmem:[%s257_s15 + $0x2c] sm:$0xf] %v991_v8  ;;  %v993_v9 = vld [vmem:[%s260_s14 + $0x68] sm:$0xf] }
  0x18   : > { %994 = vst [vmem:[%s257_s15 + $0x38] sm:$0xf] %v993_v9 }
  0x19 PF: > { %p995_p5 = scmp.ge.s32.totalorder %s1134_s26, 1  ;;  %p313_p6 = scmp.lt.s32.totalorder %s1134_s26, 3 }
  0x1b   : > { %p314_p7 = pnand %p995_p5, %p313_p6 }
  0x1c   : > { %s320_s16 = sand.u32 (!%p314_p7), 1, %s1126_s24   ;;  %s363_s17 = smul.u32 (!%p314_p7), 3, %s1195_s27  ;;  %v1136_v10 = vmov (!%p314_p7), 0   ;;  %vm403_vm0 = vcmask (!%p314_p7), 1043456   ;;  %v384_v17 = vld [vmem:[%s1308_s0] sm:$0x3] (!%p314_p7)  ;;  %v495_v38 = vlaneseq (!%p314_p7) }
  0x1d   : > { %317 = sbr.rel (%p314_p7) target bundleno = 299 (0x12b), region = 70  ;;  %445 = vmatprep.mubr.bf16.mxu1 (!%p314_p7), %v1136_v10  ;;  %609 = vmatprep.mubr.bf16.mxu0 (!%p314_p7), %v1136_v10  ;;  %p375_p9 = scmp.lt.s32.totalorder (!%p314_p7), %s1195_s27, 1  ;;  %vm567_vm1 = vcmask (!%p314_p7), 1041408   ;;  %v385_v24 = vpack.c.bf16 (!%p314_p7), %v384_v17, %v384_v17  ;;  %v386_v25 = vld [vmem:[%s1309_s1] sm:$0x3] (!%p314_p7)  ;;  %vm399_vm2 = vcmask (!%p314_p7), 64512  }
  0x1e   : > { %s1070_s18 = smul.u32 (!%p314_p7), 60, %s320_s16  ;;  %p364_p8 = scmp.lt.s32.totalorder (!%p314_p7), %s363_s17, 5  ;;  %v1137_v27 = vmov (!%p314_p7), 0.0   ;;  %v387_v29 = vpack.c.bf16 (!%p314_p7), %v386_v25, %v386_v25  ;;  %vm563_vm3 = vcmask (!%p314_p7), 293888   ;;  %vm1138_vm4 = vmmov (!%p314_p7), 0   ;;  %v661_v32 = vld [vmem:[%s1310_s2] sm:$0xff] (!%p314_p7) }
  0x1f   : > { %v662_v35 = vld [vmem:[%s1310_s2 + $0x8] sm:$0xff] (!%p314_p7)  ;;  %v663_v37 = vld [vmem:[%s1310_s2 + $0x10] sm:$0xff] (!%p314_p7)  ;;  %v496_v39 = vshrl.u32 (!%p314_p7), %v495_v38, 7  ;;  %vm873_vm5 = vcmask (!%p314_p7), 1040384   ;;  %vm876_vm6 = vcmask (!%p314_p7), 1042432   ;;  %vm879_vm7 = vcmask (!%p314_p7), 1044480  }
  0x20   : > { %s1220_s19 = scalar_lea.vmem (!%p314_p7), [#allocation2], %s1070_s18  ;;  %vm881_vm8 = vcmask (!%p314_p7), 1045504  }
  0x21   : > { %v1098_v11 = vld [vmem:[%s1220_s19 + $0x4] ss:$12 sps:$4 sm:$0xff] (!%p314_p7)   ;;  %v1100_v12 = vld [vmem:[%s1220_s19] ss:$12 sps:$4 sm:$0xff] (!%p314_p7)   ;;  %v1103_v13 = vld [vmem:[%s1220_s19 + $0x1c] ss:$12 sps:$4 sm:$0xff] (!%p314_p7)  }
  0x22   : > { %577 = vmatprep.subr.bf16.mxu0 (!%p314_p7), %v1098_v11  ;;  %v1106_v14 = vld [vmem:[%s1220_s19 + $0x18] ss:$12 sps:$4 sm:$0xff] (!%p314_p7)   ;;  %v521_v15 = vld [vmem:[%s1220_s19 + $0x30] sm:$0x33] (!%p314_p7)  ;;  %v1110_v33 = vld [vmem:[%s1220_s19 + $0x20] ss:$12 sps:$4 sm:$0xff] (!%p314_p7)  }
  0x23   : > { %578 = vmatpush1.bf16.msra.mxu0 (!%p314_p7), %v1100_v12  ;;  %v1012_v18 = vcombine.high (!%p314_p7), %v521_v15, %v521_v15  ;;  %v1011_v19 = vcombine.low (!%p314_p7), %v521_v15, %v521_v15  ;;  %v1109_v31 = vld [vmem:[%s1220_s19 + $0x8] ss:$12 sps:$4 sm:$0xff] (!%p314_p7)   ;;  %v1111_v34 = vld [vmem:[%s1220_s19 + $0x38] ss:$0 sps:$4 sm:$0x33] (!%p314_p7)   ;;  %v497_v40 = vsub.s32 (!%p314_p7), 0, %v496_v39 }
  0x24   : > { %s1320_s17 = smov (!%p364_p8, %s363_s17), 5  ;;  %s1322_s27 = smov (!%p375_p9, %s1195_s27), 1  ;;  %579 = vmatprep.subr.bf16.mxu0 %v1103_v13  ;;  %v575_v36 = vsel %vm567_vm1, %v1111_v34, 0  ;;  %v501_v42 = vsub.s32 1, %v496_v39  ;;  %v505_v2 = vsub.s32 2, %v496_v39 }
  0x25   : > { %s996_s20 = sshll.u32 %s1320_s17, 2  ;;  %s997_s29 = sshll.u32 %s1322_s27, 3  ;;  %v569_v26 = vsel %vm567_vm1, %v1011_v19, 0 }
  0x26   : > { %s372_s23 = scalar_lea.vmem %s1312_s4, %s996_s20  ;;  %s378_s12 = scalar_lea.vmem %s1314_s6, %s997_s29 }
  0x27   : > { %v389_v16 = vld [vmem:[%s372_s23] sm:$0xff]  ;;  %v1102_v21 = vld [vmem:[%s372_s23 + $0x8] ss:$0 sps:$4 sm:$0xff]   ;;  %580 = vmatpush1.bf16.msra.mxu0 %v1106_v14  ;;  %s366_s22 = scalar_lea.vmem %s1311_s3, %s1320_s17  ;;  %s382_s24 = scalar_lea.vmem %s1315_s7, %s997_s29 }
  0x28   : > { %v1000_v20 = vcombine.high %v389_v16, %v389_v16  ;;  %v999_v22 = vcombine.low %v389_v16, %v389_v16  ;;  %1014 = vmatprep.subr.msk.bf16.mxu0 %vm567_vm1, %v1012_v18  ;;  %v411_v28 = vsel %vm403_vm0, %v1102_v21, 0  ;;  %v664_v30 = vld [vmem:[%s378_s12] sm:$0xff] }
  0x29   : > { %v388_v41 = vld [vmem:[%s366_s22] sm:$0x7] }
  0x2a   : > { %1002 = vmatprep.subr.msk.bf16.mxu1 %vm403_vm0, %v1000_v20  ;;  %v405_v23 = vsel %vm403_vm0, %v999_v22, 0  ;;  %v498_v43 = vrot.slane %v388_v41, %v497_v40  ;;  %v502_v44 = vrot.slane %v388_v41, %v501_v42  ;;  %v506_v13 = vrot.slane %v388_v41, %v505_v2 }
  0x2b   : > { %414 = vmatpush1.bf16.msra.mxu1 %v405_v23  ;;  %582 = vmatpush1.bf16.msra.mxu0 %v569_v26 }
  0x2c   : > { %1033 = vmatprep.subr.bf16.mxu1 %v1137_v27  ;;  %1049 = vmatprep.subr.mxu0 %v1137_v27 }
  0x2e   : > { %1003 = vmatmul.mubr.msk.bf16.vlgmr.msra.gmra.mrb[0].mxu1 %vm399_vm2, %v385_v24  ;;  %1015 = vmatmul.mubr.msk.bf16.vlgmr.msra.gmra.mrb[0].mxu0 %vm563_vm3, %v387_v29 }
  0x2f   : > { %1034 = vmatpush3.bf16.msra.mxu1 %v411_v28  ;;  %1035 = vmatprep.mubr.msk.bf16.mxu1 %vm1138_vm4, %v1137_v27 }
  0x30   : > { %1039 = vmatprep.subr.bf16.mxu1 %v1137_v27  ;;  %1050 = vmatpush3.msra.mxu0 %v664_v30 }
  0x31   : > { %1051 = vmatprep.mubr.msk.f32.mxu0 %vm1138_vm4, %v1137_v27 }
  0x36   : > { %1036 = vmatmul.mubr.msk.bf16.vlgmr.msra.gmra.mrb[4].mxu1 %vm399_vm2, %v385_v24  ;;  %1052 = vmatmul.mubr.msk.f32.vlgmr.msra.gmra.mrb[4].mxu0 %vm399_vm2, %v661_v32 }
  0x37   : > { %1040 = vmatpush3.bf16.msra.mxu1 %v1109_v31  ;;  %1045 = vmatprep.mubr.msk.bf16.mxu1 %vm1138_vm4, %v1137_v27 }
  0x38   : > { %1041 = vmatprep.subr.bf16.mxu1 %v1137_v27  ;;  %1054 = vmatprep.mubr.msk.f32.mxu0 %vm1138_vm4, %v1137_v27 }
  0x3a   : > { %1055 = vmatmul.mubr.msk.f32.gmra.mrb[6].mxu0 %vm399_vm2, %v662_v35 }
  0x3b   : > { %1042 = vmatpush3.bf16.msra.mxu1 %v1110_v33  ;;  %1057 = vmatprep.mubr.msk.f32.mxu0 %vm1138_vm4, %v1137_v27 }
  0x3c   : > { %1043 = vmatprep.subr.bf16.mxu1 %v1137_v27 }
  0x3e   : > { %1058 = vmatmul.mubr.msk.f32.gmra.mrb[8].mxu0 %vm399_vm2, %v663_v37 }
  0x3f   : > { %1044 = vmatpush3.bf16.msra.mxu1 %v575_v36 }
  0x42   : > { %1046 = vmatmul.mubr.msk.bf16.vlgmr.msra.gmra.mrb[4].mxu1 %vm563_vm3, %v387_v29 }
 0x101   : > { %v447_v45 = vpop.f32.mrb[0].mxu1  ;;  %v611_v51 = vpop.f32.mrb[0].mxu0 }
 0x102   : > { %v510_v46 = vadd.f32 %v498_v43, %v447_v45  ;;  %v449_v47 = vpop.f32.mrb[1].mxu1  ;;  %v613_v53 = vpop.f32.mrb[1].mxu0 }
 0x103   : > { %v511_v48 = vadd.f32 %v502_v44, %v449_v47  ;;  %v451_v49 = vpop.f32.mrb[2].mxu1  ;;  %v615_v55 = vpop.f32.mrb[2].mxu0 }
 0x104   : > { %v452_v50 = vpop.f32.mrb[3].mxu1  ;;  %v658_v52 = vadd.f32 %v611_v51, %v510_v46  ;;  %v616_v56 = vpop.f32.mrb[3].mxu0 }
 0x105   : > { %v659_v54 = vadd.f32 %v613_v53, %v511_v48 }
 0x106   : > { %v776_v57 = vrot.slane %v658_v52, 4  ;;  %v809_v3 = vrot.slane %v658_v52, 5  ;;  %v827_v16 = vrot.slane %v658_v52, 1 }
 0x107   : > { %v756_v58 = vrot.slane %v659_v54, 7  ;;  %v779_v59 = vrot.slane %v659_v54, 3  ;;  %v812_v5 = vrot.slane %v659_v54, 4 }
 0x109   : > { %v1282_v60 = vpop.f32.mrb[4].mxu0 }
 0x10a   : > { %v754_v61 = vmul.f32 %v1282_v60, %v658_v52  ;;  %v758_v62 = vmul.f32 %v756_v58, %v1282_v60  ;;  %v778_v63 = vmul.f32 %v776_v57, %v1282_v60  ;;  %v1053_v0 = vpop.f32.mrb[5].mxu0  ;;  %v781_v1 = vmul.f32 %v779_v59, %v1282_v60 }
 0x10b   : > { %v772_v50 = vrot.slane %v1282_v60, 3 }
 0x10c   : > { %v760_v4 = vrot.slane %v758_v62, 1  ;;  %v783_v6 = vrot.slane %v781_v1, 1 }
 0x10d   : > { %v745_v7 = vpop.f32.mrb[6].mxu0 }
 0x10e   : > { %v794_v8 = vmul.f32 %v745_v7, %v658_v52  ;;  %v795_v9 = vmul.f32 %v756_v58, %v745_v7  ;;  %v811_v10 = vmul.f32 %v809_v3, %v745_v7  ;;  %v1056_v11 = vpop.f32.mrb[7].mxu0  ;;  %v814_v12 = vmul.f32 %v812_v5, %v745_v7 }
 0x10f   : > { %v762_v14 = vadd.f32 %v760_v4, %v754_v61  ;;  %v785_v15 = vadd.f32 %v783_v6, %v778_v63  ;;  %v806_v51 = vrot.slane %v745_v7, 3 }
 0x110   : > { %v797_v17 = vrot.slane %v795_v9, 1  ;;  %v816_v18 = vrot.slane %v814_v12, 1 }
 0x111   : > { %v750_v19 = vpop.f32.mrb[8].mxu0 }
 0x112   : > { %v799_v21 = vadd.f32 %v797_v17, %v794_v8  ;;  %v829_v22 = vmul.f32 %v827_v16, %v750_v19  ;;  %v830_v23 = vmul.f32 %v750_v19, %v659_v54  ;;  %v1059_v24 = vpop.f32.mrb[9].mxu0  ;;  %v818_v26 = vadd.f32 %v816_v18, %v811_v10 }
 0x113   : > { %v846_v27 = vmul.f32 %v809_v3, %v750_v19  ;;  %v847_v28 = vmul.f32 %v812_v5, %v750_v19  ;;  %v843_v59 = vrot.slane %v750_v19, 3 }
 0x114   : > { %v832_v30 = vrot.slane %v830_v23, 1 }
 0x115   : > { %v652_v20 = vpop.f32.mrb[4].mxu1  ;;  %v849_v38 = vrot.slane %v847_v28, 1 }
 0x116   : > { %v1064_v25 = vadd.f32 %v652_v20, %v506_v13  ;;  %v1047_v29 = vpop.f32.mrb[5].mxu1  ;;  %v834_v37 = vadd.f32 %v832_v30, %v829_v22 }
 0x117   : > { %v655_v31 = vpop.f32.mrb[6].mxu1  ;;  %v851_v44 = vadd.f32 %v849_v38, %v846_v27 }
 0x118   : > { %v764_v32 = vrot.slane %v1064_v25, 6  ;;  %v786_v33 = vrot.slane %v1064_v25, 2  ;;  %v819_v34 = vrot.slane %v1064_v25, 3  ;;  %v835_v35 = vrot.slane %v1064_v25, 7  ;;  %v1048_v36 = vpop.f32.mrb[7].mxu1 }
 0x11a   : > { %v766_v39 = vmul.f32 %v764_v32, %v1282_v60  ;;  %v788_v40 = vmul.f32 %v786_v33, %v1282_v60  ;;  %v800_v41 = vmul.f32 %v764_v32, %v745_v7  ;;  %v821_v42 = vmul.f32 %v819_v34, %v745_v7 }
 0x11b   : > { %v837_v43 = vmul.f32 %v835_v35, %v750_v19  ;;  %v852_v45 = vmul.f32 %v819_v34, %v750_v19 }
 0x11c   : > { %v768_v46 = vrot.slane %v766_v39, 2  ;;  %v790_v47 = vrot.slane %v788_v40, 2  ;;  %v802_v48 = vrot.slane %v800_v41, 2  ;;  %v823_v49 = vrot.slane %v821_v42, 2 }
 0x11d   : > { %v839_v52 = vrot.slane %v837_v43, 2  ;;  %v854_v53 = vrot.slane %v852_v45, 2 }
 0x11e   : > { %v770_v54 = vadd.f32 %v768_v46, %v762_v14  ;;  %v792_v55 = vadd.f32 %v790_v47, %v785_v15  ;;  %v804_v56 = vadd.f32 %v802_v48, %v799_v21  ;;  %v825_v57 = vadd.f32 %v823_v49, %v818_v26 }
 0x11f   : > { %v841_v58 = vadd.f32 %v839_v52, %v834_v37  ;;  %v856_v61 = vadd.f32 %v854_v53, %v851_v44 }
 0x120   : > { %v774_v62 = vadd.f32 %v772_v50, %v770_v54  ;;  %v793_v63 = vadd.f32 %v792_v55, %v772_v50  ;;  %v808_v0 = vadd.f32 %v806_v51, %v804_v56  ;;  %v826_v1 = vadd.f32 %v825_v57, %v806_v51 }
 0x121   : > { %v845_v2 = vadd.f32 %v843_v59, %v841_v58  ;;  %v857_v3 = vadd.f32 %v856_v61, %v843_v59 }
 0x122   : > { %v859_v4 = vrot.slane %v793_v63, 3  ;;  %v862_v60 = vrot.slane %v808_v0, 6  ;;  %v865_v5 = vrot.slane %v826_v1, 1 }
 0x123   : > { %v868_v8 = vrot.slane %v845_v2, 4  ;;  %v871_v10 = vrot.slane %v857_v3, 7 }
 0x124   : > { %v874_v6 = vsel %vm873_vm5, %v774_v62, %v859_v4 }
 0x125   : > { %v875_v7 = vsel %vm567_vm1, %v874_v6, %v862_v60 }
 0x126   : > { %v877_v9 = vsel %vm876_vm6, %v875_v7, %v865_v5 }
 0x127   : > { %v878_v11 = vsel %vm403_vm0, %v877_v9, %v868_v8 }
 0x128   : > { %v880_v12 = vsel %vm879_vm7, %v878_v11, %v871_v10 }
 0x129   : > { %v882_v13 = vsel %vm881_vm8, %v880_v12, 0.0 }
 0x12a   : > { %883 = vst [vmem:[%s382_s24] sm:$0xff] %v882_v13 }
 0x12b PF: > { %p14_p10 = scmp.ge.s32.totalorder %s1198_s28, 4   ;;  %s1316_s24 = smov %s1130_s25 }
 0x12c   : > { %s1317_s25 = smov %s1207_s8  ;;  %s1318_s26 = smov %s1198_s28 }
 0x12d   :  { %16 = sbr.rel (!%p14_p10) target bundleno = 2 (0x2), region = 124 }

</bundles_post_ra>
